<compile_context>
chip_gen: v7x
topology: tpu7x:2x2x1
jax: 0.10.0
libtpu: 0.0.40
codegen_flags: <defaults>
</compile_context>

<pallas_src>
import functools

import jax
import jax.numpy as jnp
from jax.experimental import pallas as pl
from jax.experimental.pallas import tpu as pltpu

BN_EPS = 1e-5
LANE = 128
SUBLANE = 8
FAST_PATH_MAX_ROWS = 512   # single fused kernel when padded batch fits one tile
BATCH_TILE = 512           # batch tile for the two-pass (large-batch) path


def _round_up(n, m):
    return ((n + m - 1) // m) * m


def _pad2(a, rows, cols):
    return jnp.pad(a, ((0, rows - a.shape[0]), (0, cols - a.shape[1])))


def _vec_spec(n):
    return pl.BlockSpec((1, n), lambda i: (0, 0))


def _vmem_limit(block_bytes):
    """Generation-aware VMEM limit (v7x: 64 MiB physical, v5e/v6e: 128 MiB)."""
    try:
        cap = pltpu.get_tpu_info().vmem_capacity_bytes
    except Exception:  # interpret mode / info unavailable
        cap = 64 << 20
    # Pallas double-buffers each spec independently; add headroom.
    est = 2 * sum(block_bytes) + (4 << 20)
    return int(min(max(est, 16 << 20), int(0.75 * cap)))


# ---------------------------------------------------------------------------
# Fast path: fully fused bottleneck + BatchNorm + ReLU + classifier (grid=(1,))
# ---------------------------------------------------------------------------
def _fused_kernel(x_ref, w1_ref, gamma_ref, beta_ref,
                  wc1_ref, bc1_ref, wc2_ref, bc2_ref, wc3_ref, bc3_ref,
                  out_ref, xout_ref, *, inv_b, batch):
    # Bottleneck matmul: bf16 operands, f32 accumulation (b1 cancelled by BN).
    h = jnp.dot(x_ref[...], w1_ref[...], preferred_element_type=jnp.float32)

    # Training-mode BatchNorm statistics over the logical batch. Padded batch
    # rows of x are zero, so they contribute nothing to the sum; they are
    # masked out of the centered variance so it stays exact and stable.
    mean = jnp.sum(h, axis=0, keepdims=True) * inv_b
    row = jax.lax.broadcasted_iota(jnp.int32, h.shape, 0)
    valid = (row < batch).astype(jnp.float32)
    d = (h - mean) * valid
    var = jnp.sum(d * d, axis=0, keepdims=True) * inv_b

    scale = gamma_ref[...] * jax.lax.rsqrt(var + BN_EPS)
    shift = beta_ref[...] - mean * scale
    hn = jnp.maximum(h * scale + shift, 0.0)            # BN + ReLU
    xout_ref[...] = hn.astype(xout_ref.dtype)

    c = jnp.dot(hn.astype(jnp.bfloat16), wc1_ref[...],
                preferred_element_type=jnp.float32) + bc1_ref[...]
    c = jnp.maximum(c, 0.0)
    c = jnp.dot(c.astype(jnp.bfloat16), wc2_ref[...],
                preferred_element_type=jnp.float32) + bc2_ref[...]
    c = jnp.maximum(c, 0.0)
    out = jnp.dot(c.astype(jnp.bfloat16), wc3_ref[...],
                  preferred_element_type=jnp.float32) + bc3_ref[...]
    out_ref[...] = out.astype(out_ref.dtype)


# ---------------------------------------------------------------------------
# Large-batch pass 1: per-tile partial BN statistics (no h write-back to HBM).
# ---------------------------------------------------------------------------
def _stats_kernel(x_ref, w1_ref, stats_ref):
    # Row 0 of the (8, Hp) output block is sum(h), row 1 is sum(h*h). Each
    # grid step owns its own output block, so the axis can be "parallel";
    # the tiny reduction over tiles happens in the wrapper.
    h = jnp.dot(x_ref[...], w1_ref[...], preferred_element_type=jnp.float32)
    stats_ref[...] = jnp.zeros_like(stats_ref)
    stats_ref[0:1, :] = jnp.sum(h, axis=0, keepdims=True)
    stats_ref[1:2, :] = jnp.sum(h * h, axis=0, keepdims=True)


# ---------------------------------------------------------------------------
# Large-batch pass 2: recompute h = x@W1, apply precomputed BN affine + ReLU,
# then the classifier.
# ---------------------------------------------------------------------------
def _bn_classifier_kernel(x_ref, w1_ref, s_ref, off_ref,
                          wc1_ref, bc1_ref, wc2_ref, bc2_ref, wc3_ref, bc3_ref,
                          out_ref, xout_ref):
    h = jnp.dot(x_ref[...], w1_ref[...], preferred_element_type=jnp.float32)
    hn = jnp.maximum(h * s_ref[...] + off_ref[...], 0.0)
    xout_ref[...] = hn.astype(xout_ref.dtype)

    c = jnp.dot(hn.astype(jnp.bfloat16), wc1_ref[...],
                preferred_element_type=jnp.float32) + bc1_ref[...]
    c = jnp.maximum(c, 0.0)
    c = jnp.dot(c.astype(jnp.bfloat16), wc2_ref[...],
                preferred_element_type=jnp.float32) + bc2_ref[...]
    c = jnp.maximum(c, 0.0)
    out = jnp.dot(c.astype(jnp.bfloat16), wc3_ref[...],
                  preferred_element_type=jnp.float32) + bc3_ref[...]
    out_ref[...] = out.astype(out_ref.dtype)


# ---------------------------------------------------------------------------
# Parameter preparation (one-time; hoisted out of the forward pass)
# ---------------------------------------------------------------------------
def prepare_params(params):
    E, H = params["w1"].shape
    W = params["wc1"].shape[1]
    C = params["wc3"].shape[1]
    # Lane-dense (128) padding. (On v6e/v7x, padding large production dims to
    # 256 would fill the 256x256 MXU better; it is wasteful at small sizes.)
    Ep, Hp, Wp, Cp = (_round_up(d, LANE) for d in (E, H, W, C))
    prep = {
        # params["b1"] is intentionally not used: it is algebraically
        # cancelled by the training-mode BatchNorm mean subtraction.
        "w1": _pad2(params["w1"], Ep, Hp).astype(jnp.bfloat16),
        "gamma": _pad2(params["gamma"], 1, Hp),
        "beta": _pad2(params["beta"], 1, Hp),
        "wc1": _pad2(params["wc1"], Hp, Wp).astype(jnp.bfloat16),
        "bc1": _pad2(params["bc1"], 1, Wp),
        "wc2": _pad2(params["wc2"], Wp, Wp).astype(jnp.bfloat16),
        "bc2": _pad2(params["bc2"], 1, Wp),
        "wc3": _pad2(params["wc3"], Wp, Cp).astype(jnp.bfloat16),
        "bc3": _pad2(params["bc3"], 1, Cp),
    }
    dims = {"E": E, "H": H, "W": W, "C": C,
            "Ep": Ep, "Hp": Hp, "Wp": Wp, "Cp": Cp}
    return prep, dims


# ---------------------------------------------------------------------------
# Forward wrapper
# ---------------------------------------------------------------------------
def mlp_block_forward(x, prep, dims):
    B = x.shape[0]
    E, H, C = dims["E"], dims["H"], dims["C"]
    Ep, Hp, Wp, Cp = dims["Ep"], dims["Hp"], dims["Wp"], dims["Cp"]
    assert x.shape[1] == E

    mm_flops_per_row = 2 * (Ep * Hp + Hp * Wp + Wp * Wp + Wp * Cp)
    weight_bytes = ((Ep * Hp + Hp * Wp + Wp * Wp + Wp * Cp) * 2
                    + (2 * Hp + 2 * Wp + Cp) * 4)

    Bp_small = _round_up(B, SUBLANE)
    if Bp_small <= FAST_PATH_MAX_ROWS:
        # ---------------- fast path: one fused launch ----------------------
        Bp = Bp_small
        xb = _pad2(x, Bp, Ep).astype(jnp.bfloat16)
        blk = [Bp * Ep * 2, weight_bytes, Bp * Cp * 4, Bp * Hp * 4]
        kernel = functools.partial(_fused_kernel, inv_b=1.0 / B, batch=B)
        out_p, xout_p = pl.pallas_call(
            kernel,
            out_shape=(jax.ShapeDtypeStruct((Bp, Cp), jnp.float32),
                       jax.ShapeDtypeStruct((Bp, Hp), jnp.float32)),
            grid=(1,),
            in_specs=[pl.BlockSpec((Bp, Ep), lambda i: (0, 0)),
                      pl.BlockSpec((Ep, Hp), lambda i: (0, 0)),
                      _vec_spec(Hp), _vec_spec(Hp),
                      pl.BlockSpec((Hp, Wp), lambda i: (0, 0)), _vec_spec(Wp),
                      pl.BlockSpec((Wp, Wp), lambda i: (0, 0)), _vec_spec(Wp),
                      pl.BlockSpec((Wp, Cp), lambda i: (0, 0)), _vec_spec(Cp)],
            out_specs=(pl.BlockSpec((Bp, Cp), lambda i: (0, 0)),
                       pl.BlockSpec((Bp, Hp), lambda i: (0, 0))),
            compiler_params=pltpu.CompilerParams(
                dimension_semantics=("arbitrary",),
                vmem_limit_bytes=_vmem_limit(blk)),
            cost_estimate=pl.CostEstimate(
                flops=Bp * mm_flops_per_row,
                transcendentals=Hp,
                bytes_accessed=Bp * Ep * 2 + weight_bytes + Bp * (Cp + Hp) * 4),
        )(xb, prep["w1"], prep["gamma"], prep["beta"],
          prep["wc1"], prep["bc1"], prep["wc2"], prep["bc2"],
          prep["wc3"], prep["bc3"])
        return out_p[:B, :C], xout_p[:B, :H]

    # ---------------- large-batch path: two "parallel" batch-tiled passes ---
    tm = BATCH_TILE
    Bp = _round_up(B, tm)
    nb = Bp // tm
    xb = _pad2(x, Bp, Ep).astype(jnp.bfloat16)

    # Pass 1: per-tile partial BN statistics (no h round trip through HBM).
    blk1 = [tm * Ep * 2, Ep * Hp * 2, 8 * Hp * 4]
    stats = pl.pallas_call(
        _stats_kernel,
        out_shape=jax.ShapeDtypeStruct((nb * 8, Hp), jnp.float32),
        grid=(nb,),
        in_specs=[pl.BlockSpec((tm, Ep), lambda i: (i, 0)),
                  pl.BlockSpec((Ep, Hp), lambda i: (0, 0))],
        out_specs=pl.BlockSpec((8, Hp), lambda i: (i, 0)),
        compiler_params=pltpu.CompilerParams(
            dimension_semantics=("parallel",),
            vmem_limit_bytes=_vmem_limit(blk1)),
        cost_estimate=pl.CostEstimate(
            flops=2 * Bp * Ep * Hp,
            transcendentals=0,
            bytes_accessed=Bp * Ep * 2 + Ep * Hp * 2 + nb * 8 * Hp * 4),
    )(xb, prep["w1"])

    # Tiny (1, Hp) reduction + BN coefficients, computed once in XLA.
    # Padded feature columns: sum=ssq=0, gamma=0 -> scale=0, shift=0 -> hn=0.
    stats = stats.reshape(nb, 8, Hp)
    bn_sum = jnp.sum(stats[:, 0, :], axis=0, keepdims=True)
    bn_ssq = jnp.sum(stats[:, 1, :], axis=0, keepdims=True)
    mean = bn_sum / B
    var = jnp.maximum(bn_ssq / B - mean * mean, 0.0)
    s = prep["gamma"] * jax.lax.rsqrt(var + BN_EPS)
    off = prep["beta"] - mean * s

    # Pass 2: recompute h = x @ W1, BN affine + ReLU, classifier.
    blk2 = [tm * Ep * 2, weight_bytes, 2 * Hp * 4, tm * Cp * 4, tm * Hp * 4]
    out_p, xout_p = pl.pallas_call(
        _bn_classifier_kernel,
        out_shape=(jax.ShapeDtypeStruct((Bp, Cp), jnp.float32),
                   jax.ShapeDtypeStruct((Bp, Hp), jnp.float32)),
        grid=(nb,),
        in_specs=[pl.BlockSpec((tm, Ep), lambda i: (i, 0)),
                  pl.BlockSpec((Ep, Hp), lambda i: (0, 0)),
                  _vec_spec(Hp), _vec_spec(Hp),
                  pl.BlockSpec((Hp, Wp), lambda i: (0, 0)), _vec_spec(Wp),
                  pl.BlockSpec((Wp, Wp), lambda i: (0, 0)), _vec_spec(Wp),
                  pl.BlockSpec((Wp, Cp), lambda i: (0, 0)), _vec_spec(Cp)],
        out_specs=(pl.BlockSpec((tm, Cp), lambda i: (i, 0)),
                   pl.BlockSpec((tm, Hp), lambda i: (i, 0))),
        compiler_params=pltpu.CompilerParams(
            dimension_semantics=("parallel",),
            vmem_limit_bytes=_vmem_limit(blk2)),
        cost_estimate=pl.CostEstimate(
            flops=Bp * mm_flops_per_row,
            transcendentals=0,
            bytes_accessed=(Bp * Ep * 2 + weight_bytes + 2 * Hp * 4
                            + Bp * (Cp + Hp) * 4)),
    )(xb, prep["w1"], s, off,
      prep["wc1"], prep["bc1"], prep["wc2"], prep["bc2"],
      prep["wc3"], prep["bc3"])

    return out_p[:B, :C], xout_p[:B, :H]


# ---------------------------------------------------------------------------
# Parameter init (matches the PyTorch module's xavier_normal_ / zero-bias)
# ---------------------------------------------------------------------------
def xavier_normal(key, fan_in, fan_out):
    std = (2.0 / (fan_in + fan_out)) ** 0.5
    return std * jax.random.normal(key, (fan_in, fan_out), dtype=jnp.float32)


def init_params(key, embedding_dim, num_class):
    E = embedding_dim
    H = 2 * E
    W = H // 2  # classifier depth == 2
    k1, k2, k3, k4 = jax.random.split(key, 4)
    return {
        # Bottleneck Linear(E, 2E). b1 is zero-initialized by the module and,
        # regardless of value, cancelled by the training-mode BatchNorm.
        "w1": xavier_normal(k1, E, H),
        "b1": jnp.zeros((1, H), jnp.float32),
        # BatchNorm1d(2E) affine parameters (default init).
        "gamma": jnp.ones((1, H), jnp.float32),
        "beta": jnp.zeros((1, H), jnp.float32),
        # Classifier: Linear(2E, W) -> ReLU -> Linear(W, W) -> ReLU -> Linear(W, C).
        "wc1": xavier_normal(k2, H, W),
        "bc1": jnp.zeros((1, W), jnp.float32),
        "wc2": xavier_normal(k3, W, W),
        "bc2": jnp.zeros((1, W), jnp.float32),
        "wc3": xavier_normal(k4, W, num_class),
        "bc3": jnp.zeros((1, num_class), jnp.float32),
    }


def reference_forward(x, params):
    # Pure-JAX reference mirroring the kernels' bf16 MXU operands / f32
    # accumulation and training-mode BatchNorm (biased batch statistics).
    f32 = jnp.float32
    h = jnp.dot(x.astype(jnp.bfloat16), params["w1"].astype(jnp.bfloat16),
                preferred_element_type=f32) + params["b1"]
    mean = jnp.mean(h, axis=0, keepdims=True)
    var = jnp.mean((h - mean) ** 2, axis=0, keepdims=True)
    hn = jnp.maximum((h - mean) * jax.lax.rsqrt(var + BN_EPS)
                     * params["gamma"] + params["beta"], 0.0)
    x_out = hn
    c = jnp.maximum(jnp.dot(hn.astype(jnp.bfloat16),
                            params["wc1"].astype(jnp.bfloat16),
                            preferred_element_type=f32) + params["bc1"], 0.0)
    c = jnp.maximum(jnp.dot(c.astype(jnp.bfloat16),
                            params["wc2"].astype(jnp.bfloat16),
                            preferred_element_type=f32) + params["bc2"], 0.0)
    out = jnp.dot(c.astype(jnp.bfloat16), params["wc3"].astype(jnp.bfloat16),
                  preferred_element_type=f32) + params["bc3"]
    return out, x_out


if __name__ == "__main__":
    embedding_dim = 32
    mlp_dim = 64        # constructor arg; unused by the forward pass
    num_class = 4

    key = jax.random.PRNGKey(0)
    kx1, kx2, kp = jax.random.split(key, 3)
    params = init_params(kp, embedding_dim, num_class)
    prep, dims = prepare_params(params)   # one-time weight pad/cast

    # Small batch -> single fused kernel (fast path).
    x1 = jax.random.normal(kx1, (8, embedding_dim), dtype=jnp.float32)
    out1, xout1 = jax.block_until_ready(mlp_block_forward(x1, prep, dims))
    ref1, refx1 = reference_forward(x1, params)
    assert out1.shape == (8, num_class)
    assert xout1.shape == (8, 2 * embedding_dim)
    assert jnp.allclose(out1, ref1, atol=2e-2, rtol=2e-2)
    assert jnp.allclose(xout1, refx1, atol=2e-2, rtol=2e-2)

    # Larger batch -> batch-tiled two-pass path (partial stats + recompute).
    x2 = jax.random.normal(kx2, (600, embedding_dim), dtype=jnp.float32)
    out2, xout2 = jax.block_until_ready(mlp_block_forward(x2, prep, dims))
    ref2, refx2 = reference_forward(x2, params)
    assert out2.shape == (600, num_class)
    assert xout2.shape == (600, 2 * embedding_dim)
    assert jnp.allclose(out2, ref2, atol=2e-2, rtol=2e-2)
    assert jnp.allclose(xout2, refx2, atol=2e-2, rtol=2e-2)

    print("KERNEL_OK")
</pallas_src>

<mosaic_0001>
module attributes {stable_mosaic.version = 11 : i64} {
  func.func @_fused_kernel(%arg0: i32, %arg1: memref<8x128xbf16, #tpu.memory_space<vmem>>, %arg2: memref<128x128xbf16, #tpu.memory_space<vmem>>, %arg3: memref<1x128xf32, #tpu.memory_space<vmem>>, %arg4: memref<1x128xf32, #tpu.memory_space<vmem>>, %arg5: memref<128x128xbf16, #tpu.memory_space<vmem>>, %arg6: memref<1x128xf32, #tpu.memory_space<vmem>>, %arg7: memref<128x128xbf16, #tpu.memory_space<vmem>>, %arg8: memref<1x128xf32, #tpu.memory_space<vmem>>, %arg9: memref<128x128xbf16, #tpu.memory_space<vmem>>, %arg10: memref<1x128xf32, #tpu.memory_space<vmem>>, %arg11: memref<8x128xf32, #tpu.memory_space<vmem>>, %arg12: memref<8x128xf32, #tpu.memory_space<vmem>>) attributes {dimension_semantics = [#tpu.dimension_semantics<arbitrary>], iteration_bounds = array<i64: 1>, scalar_prefetch = 0 : i64, scratch_operands = 0 : i64, tpu.core_type = #tpu.core_type<tc>, window_params = [{pipeline_mode = #tpu.pipeline_mode<synchronous>, transform_indices = @transform_0, window_bounds = array<i64: 8, 128>}, {pipeline_mode = #tpu.pipeline_mode<synchronous>, transform_indices = @transform_1, window_bounds = array<i64: 128, 128>}, {pipeline_mode = #tpu.pipeline_mode<synchronous>, transform_indices = @transform_2, window_bounds = array<i64: 1, 128>}, {pipeline_mode = #tpu.pipeline_mode<synchronous>, transform_indices = @transform_3, window_bounds = array<i64: 1, 128>}, {pipeline_mode = #tpu.pipeline_mode<synchronous>, transform_indices = @transform_4, window_bounds = array<i64: 128, 128>}, {pipeline_mode = #tpu.pipeline_mode<synchronous>, transform_indices = @transform_5, window_bounds = array<i64: 1, 128>}, {pipeline_mode = #tpu.pipeline_mode<synchronous>, transform_indices = @transform_6, window_bounds = array<i64: 128, 128>}, {pipeline_mode = #tpu.pipeline_mode<synchronous>, transform_indices = @transform_7, window_bounds = array<i64: 1, 128>}, {pipeline_mode = #tpu.pipeline_mode<synchronous>, transform_indices = @transform_8, window_bounds = array<i64: 128, 128>}, {pipeline_mode = #tpu.pipeline_mode<synchronous>, transform_indices = @transform_9, window_bounds = array<i64: 1, 128>}, {pipeline_mode = #tpu.pipeline_mode<synchronous>, transform_indices = @transform_10, window_bounds = array<i64: 8, 128>}, {pipeline_mode = #tpu.pipeline_mode<synchronous>, transform_indices = @transform_11, window_bounds = array<i64: 8, 128>}]} {
    %c0 = arith.constant 0 : index
    %c0_0 = arith.constant 0 : index
    %0 = vector.load %arg1[%c0, %c0_0] : memref<8x128xbf16, #tpu.memory_space<vmem>>, vector<8x128xbf16>
    %c0_1 = arith.constant 0 : index
    %c0_2 = arith.constant 0 : index
    %1 = vector.load %arg2[%c0_1, %c0_2] : memref<128x128xbf16, #tpu.memory_space<vmem>>, vector<128x128xbf16>
    %cst = arith.constant dense<0.000000e+00> : vector<8x128xf32>
    %2 = tpu.matmul %0, %1, %cst {dimension_numbers = #tpu.dot_dimension_numbers<[1], [0], [0], [1], [0, 0, 1, 1], [], []>} : vector<8x128xbf16>, vector<128x128xbf16>, vector<8x128xf32> -> vector<8x128xf32>
    %cst_3 = arith.constant dense<0.000000e+00> : vector<128xf32>
    %3 = vector.multi_reduction <add>, %2, %cst_3 [0] : vector<8x128xf32> to vector<128xf32>
    %4 = vector.shape_cast %3 : vector<128xf32> to vector<1x128xf32>
    %cst_4 = arith.constant 1.250000e-01 : f32
    %5 = vector.broadcast %cst_4 : f32 to vector<1x128xf32>
    %6 = arith.mulf %4, %5 : vector<1x128xf32>
    %7 = tpu.iota {dimensions = array<i32: 0>} : vector<8x128xi32>
    %c8_i32 = arith.constant 8 : i32
    %8 = vector.broadcast %c8_i32 : i32 to vector<8x128xi32>
    %9 = arith.cmpi slt, %7, %8 : vector<8x128xi32>
    %10 = arith.extui %9 : vector<8x128xi1> to vector<8x128xi32>
    %11 = arith.sitofp %10 : vector<8x128xi32> to vector<8x128xf32>
    %12 = vector.broadcast %6 : vector<1x128xf32> to vector<8x128xf32>
    %13 = arith.subf %2, %12 : vector<8x128xf32>
    %14 = arith.mulf %13, %11 : vector<8x128xf32>
    %15 = arith.mulf %14, %14 : vector<8x128xf32>
    %cst_5 = arith.constant dense<0.000000e+00> : vector<128xf32>
    %16 = vector.multi_reduction <add>, %15, %cst_5 [0] : vector<8x128xf32> to vector<128xf32>
    %17 = vector.shape_cast %16 : vector<128xf32> to vector<1x128xf32>
    %cst_6 = arith.constant 1.250000e-01 : f32
    %18 = vector.broadcast %cst_6 : f32 to vector<1x128xf32>
    %19 = arith.mulf %17, %18 : vector<1x128xf32>
    %c0_7 = arith.constant 0 : index
    %c0_8 = arith.constant 0 : index
    %20 = vector.load %arg3[%c0_7, %c0_8] : memref<1x128xf32, #tpu.memory_space<vmem>>, vector<1x128xf32>
    %cst_9 = arith.constant 9.99999974E-6 : f32
    %21 = vector.broadcast %cst_9 : f32 to vector<1x128xf32>
    %22 = arith.addf %19, %21 : vector<1x128xf32>
    %23 = math.rsqrt %22 : vector<1x128xf32>
    %24 = arith.mulf %20, %23 : vector<1x128xf32>
    %c0_10 = arith.constant 0 : index
    %c0_11 = arith.constant 0 : index
    %25 = vector.load %arg4[%c0_10, %c0_11] : memref<1x128xf32, #tpu.memory_space<vmem>>, vector<1x128xf32>
    %26 = arith.mulf %6, %24 : vector<1x128xf32>
    %27 = arith.subf %25, %26 : vector<1x128xf32>
    %28 = vector.broadcast %24 : vector<1x128xf32> to vector<8x128xf32>
    %29 = arith.mulf %2, %28 : vector<8x128xf32>
    %30 = vector.broadcast %27 : vector<1x128xf32> to vector<8x128xf32>
    %31 = arith.addf %29, %30 : vector<8x128xf32>
    %cst_12 = arith.constant 0.000000e+00 : f32
    %32 = vector.broadcast %cst_12 : f32 to vector<8x128xf32>
    %33 = arith.maximumf %31, %32 : vector<8x128xf32>
    %c0_13 = arith.constant 0 : index
    %c0_14 = arith.constant 0 : index
    %34 = vector.load %arg12[%c0_13, %c0_14] : memref<8x128xf32, #tpu.memory_space<vmem>>, vector<8x128xf32>
    tpu.vector_store %arg12[%c0_13, %c0_14], %33 {strides = array<i32>} : memref<8x128xf32, #tpu.memory_space<vmem>>, vector<8x128xf32>,
    %35 = arith.truncf %33 : vector<8x128xf32> to vector<8x128xbf16>
    %c0_15 = arith.constant 0 : index
    %c0_16 = arith.constant 0 : index
    %36 = vector.load %arg5[%c0_15, %c0_16] : memref<128x128xbf16, #tpu.memory_space<vmem>>, vector<128x128xbf16>
    %cst_17 = arith.constant dense<0.000000e+00> : vector<8x128xf32>
    %37 = tpu.matmul %35, %36, %cst_17 {dimension_numbers = #tpu.dot_dimension_numbers<[1], [0], [0], [1], [0, 0, 1, 1], [], []>} : vector<8x128xbf16>, vector<128x128xbf16>, vector<8x128xf32> -> vector<8x128xf32>
    %c0_18 = arith.constant 0 : index
    %c0_19 = arith.constant 0 : index
    %38 = vector.load %arg6[%c0_18, %c0_19] : memref<1x128xf32, #tpu.memory_space<vmem>>, vector<1x128xf32>
    %39 = vector.broadcast %38 : vector<1x128xf32> to vector<8x128xf32>
    %40 = arith.addf %37, %39 : vector<8x128xf32>
    %cst_20 = arith.constant 0.000000e+00 : f32
    %41 = vector.broadcast %cst_20 : f32 to vector<8x128xf32>
    %42 = arith.maximumf %40, %41 : vector<8x128xf32>
    %43 = arith.truncf %42 : vector<8x128xf32> to vector<8x128xbf16>
    %c0_21 = arith.constant 0 : index
    %c0_22 = arith.constant 0 : index
    %44 = vector.load %arg7[%c0_21, %c0_22] : memref<128x128xbf16, #tpu.memory_space<vmem>>, vector<128x128xbf16>
    %cst_23 = arith.constant dense<0.000000e+00> : vector<8x128xf32>
    %45 = tpu.matmul %43, %44, %cst_23 {dimension_numbers = #tpu.dot_dimension_numbers<[1], [0], [0], [1], [0, 0, 1, 1], [], []>} : vector<8x128xbf16>, vector<128x128xbf16>, vector<8x128xf32> -> vector<8x128xf32>
    %c0_24 = arith.constant 0 : index
    %c0_25 = arith.constant 0 : index
    %46 = vector.load %arg8[%c0_24, %c0_25] : memref<1x128xf32, #tpu.memory_space<vmem>>, vector<1x128xf32>
    %47 = vector.broadcast %46 : vector<1x128xf32> to vector<8x128xf32>
    %48 = arith.addf %45, %47 : vector<8x128xf32>
    %cst_26 = arith.constant 0.000000e+00 : f32
    %49 = vector.broadcast %cst_26 : f32 to vector<8x128xf32>
    %50 = arith.maximumf %48, %49 : vector<8x128xf32>
    %51 = arith.truncf %50 : vector<8x128xf32> to vector<8x128xbf16>
    %c0_27 = arith.constant 0 : index
    %c0_28 = arith.constant 0 : index
    %52 = vector.load %arg9[%c0_27, %c0_28] : memref<128x128xbf16, #tpu.memory_space<vmem>>, vector<128x128xbf16>
    %cst_29 = arith.constant dense<0.000000e+00> : vector<8x128xf32>
    %53 = tpu.matmul %51, %52, %cst_29 {dimension_numbers = #tpu.dot_dimension_numbers<[1], [0], [0], [1], [0, 0, 1, 1], [], []>} : vector<8x128xbf16>, vector<128x128xbf16>, vector<8x128xf32> -> vector<8x128xf32>
    %c0_30 = arith.constant 0 : index
    %c0_31 = arith.constant 0 : index
    %54 = vector.load %arg10[%c0_30, %c0_31] : memref<1x128xf32, #tpu.memory_space<vmem>>, vector<1x128xf32>
    %55 = vector.broadcast %54 : vector<1x128xf32> to vector<8x128xf32>
    %56 = arith.addf %53, %55 : vector<8x128xf32>
    %c0_32 = arith.constant 0 : index
    %c0_33 = arith.constant 0 : index
    %57 = vector.load %arg11[%c0_32, %c0_33] : memref<8x128xf32, #tpu.memory_space<vmem>>, vector<8x128xf32>
    tpu.vector_store %arg11[%c0_32, %c0_33], %56 {strides = array<i32>} : memref<8x128xf32, #tpu.memory_space<vmem>>, vector<8x128xf32>,
    return
  }
  func.func @transform_0(%arg0: i32) -> (i32, i32) {
    %c0_i32 = arith.constant 0 : i32
    %c0_i32_0 = arith.constant 0 : i32
    %c0_i32_1 = arith.constant 0 : i32
    return %c0_i32, %c0_i32_0 : i32, i32
  }
  func.func @transform_1(%arg0: i32) -> (i32, i32) {
    %c0_i32 = arith.constant 0 : i32
    %c0_i32_0 = arith.constant 0 : i32
    %c0_i32_1 = arith.constant 0 : i32
    return %c0_i32, %c0_i32_0 : i32, i32
  }
  func.func @transform_2(%arg0: i32) -> (i32, i32) {
    %c0_i32 = arith.constant 0 : i32
    %c0_i32_0 = arith.constant 0 : i32
    %c0_i32_1 = arith.constant 0 : i32
    return %c0_i32, %c0_i32_0 : i32, i32
  }
  func.func @transform_3(%arg0: i32) -> (i32, i32) {
    %c0_i32 = arith.constant 0 : i32
    %c0_i32_0 = arith.constant 0 : i32
    %c0_i32_1 = arith.constant 0 : i32
    return %c0_i32, %c0_i32_0 : i32, i32
  }
  func.func @transform_4(%arg0: i32) -> (i32, i32) {
    %c0_i32 = arith.constant 0 : i32
    %c0_i32_0 = arith.constant 0 : i32
    %c0_i32_1 = arith.constant 0 : i32
    return %c0_i32, %c0_i32_0 : i32, i32
  }
  func.func @transform_5(%arg0: i32) -> (i32, i32) {
    %c0_i32 = arith.constant 0 : i32
    %c0_i32_0 = arith.constant 0 : i32
    %c0_i32_1 = arith.constant 0 : i32
    return %c0_i32, %c0_i32_0 : i32, i32
  }
  func.func @transform_6(%arg0: i32) -> (i32, i32) {
    %c0_i32 = arith.constant 0 : i32
    %c0_i32_0 = arith.constant 0 : i32
    %c0_i32_1 = arith.constant 0 : i32
    return %c0_i32, %c0_i32_0 : i32, i32
  }
  func.func @transform_7(%arg0: i32) -> (i32, i32) {
    %c0_i32 = arith.constant 0 : i32
    %c0_i32_0 = arith.constant 0 : i32
    %c0_i32_1 = arith.constant 0 : i32
    return %c0_i32, %c0_i32_0 : i32, i32
  }
  func.func @transform_8(%arg0: i32) -> (i32, i32) {
    %c0_i32 = arith.constant 0 : i32
    %c0_i32_0 = arith.constant 0 : i32
    %c0_i32_1 = arith.constant 0 : i32
    return %c0_i32, %c0_i32_0 : i32, i32
  }
  func.func @transform_9(%arg0: i32) -> (i32, i32) {
    %c0_i32 = arith.constant 0 : i32
    %c0_i32_0 = arith.constant 0 : i32
    %c0_i32_1 = arith.constant 0 : i32
    return %c0_i32, %c0_i32_0 : i32, i32
  }
  func.func @transform_10(%arg0: i32) -> (i32, i32) {
    %c0_i32 = arith.constant 0 : i32
    %c0_i32_0 = arith.constant 0 : i32
    %c0_i32_1 = arith.constant 0 : i32
    return %c0_i32, %c0_i32_0 : i32, i32
  }
  func.func @transform_11(%arg0: i32) -> (i32, i32) {
    %c0_i32 = arith.constant 0 : i32
    %c0_i32_0 = arith.constant 0 : i32
    %c0_i32_1 = arith.constant 0 : i32
    return %c0_i32, %c0_i32_0 : i32, i32
  }
}

</mosaic_0001>

<bundles_post_ra>
// kernel: tpu_custom_call.1
= control target key start
LH: loop header
LB: loop body
LE: loop exit
PB: predicated region body
PF: predicated region fallthrough
CT: control target
= control target key end

     0   :  { %17 = vsyncpa [#allocation3], 0  ;;  %s1208_s0 = inlined_call_operand.hbm [shape: bf16[8,128], index: 0, kind: input, shape index: {}]   ;;  %s1209_s1 = inlined_call_operand.hbm [shape: bf16[128,128], index: 1, kind: input, shape index: {}]   ;;  %s1210_s2 = inlined_call_operand.vmem [shape: f32[1,128], index: 2, kind: input, shape index: {}]   ;;  %s1211_s3 = inlined_call_operand.vmem [shape: f32[1,128], index: 3, kind: input, shape index: {}]   ;;  %s1212_s4 = inlined_call_operand.hbm [shape: bf16[128,128], index: 4, kind: input, shape index: {}]   ;;  %s1213_s5 = inlined_call_operand.vmem [shape: f32[1,128], index: 5, kind: input, shape index: {}]   ;;  %s1214_s6 = inlined_call_operand.hbm [shape: bf16[128,128], index: 6, kind: input, shape index: {}]   ;;  %s1215_s7 = inlined_call_operand.vmem [shape: f32[1,128], index: 7, kind: input, shape index: {}]   ;;  %s1216_s8 = inlined_call_operand.hbm [shape: bf16[128,128], index: 8, kind: input, shape index: {}]   ;;  %s1217_s9 = inlined_call_operand.vmem [shape: f32[1,128], index: 9, kind: input, shape index: {}]   ;;  %s1218_s10 = inlined_call_operand.hbm [shape: f32[8,128], index: 10, kind: output, shape index: {0}]   ;;  %s1219_s11 = inlined_call_operand.hbm [shape: f32[8,128], index: 11, kind: output, shape index: {1}]  }
   0x1   :  { %18 = vsyncpa [#allocation6], 0 }
   0x2   :  { %19 = vsyncpa [#allocation9], 0 }
   0x3   :  { %20 = vsyncpa [#allocation4], 0 }
   0x4   :  { %21 = vsyncpa [#allocation13], 0  ;;  %s986_s17 = smov [#allocation5]   ;;  %s822_s21 = scalar_lea.hbm %s1209_s1, 1024 }
   0x5   :  { %s37_s18 = sshll.u32 %s986_s17, 4  ;;  %p823_p0 = scmp.ne.s32.totalorder %s1209_s1, %s822_s21  ;;  %s38_s18 = int_to_ptr.vmem [resolvable:$true] %s37_s18 }
   0x6   :  { %p826_p1 = scmp.lt.u32.totalorder %s822_s21, %s1209_s1 }
   0x8   :  { %p828_p2 = pnand %p826_p1, %p823_p0 }
   0xa   :  { %831 = shalt.err (!%p828_p2)
}
   0xb   :  { %s832_s26 = scalar_lea.vmem %s38_s18, 1024  ;;  %p837_p4 = scmp.lt.s32.totalorder %s38_s18, %s38_s18 }
   0xc   :  { %p833_p3 = scmp.ne.s32.totalorder %s38_s18, %s832_s26  ;;  %p838_p5 = scmp.lt.s32.totalorder %s832_s26, %s832_s26 }
   0xe   :  { %p839_p6 = por %p838_p5, %p837_p4 }
  0x10   :  { %p840_p7 = pnand %p839_p6, %p833_p3 }
  0x12   :  { %843 = shalt.err (!%p840_p7)
}
  0x13   :  { %s987_s27 = smov 64   ;;  %s988_s28 = smov 4  }
  0x14   :  { %43 = dma.hbm_to_vmem [thread:$0]  %s1209_s1, 1024, %s38_s18, [#allocation6], %s987_s27, %s987_s27, %s988_s28  }
  0x15   :  { %s989_s12 = smov [#allocation8]   ;;  %s990_s14 = smov [#allocation2]  }
  0x16   :  { %s67_s13 = sshll.u32 %s989_s12, 4  ;;  %s28_s15 = sshll.u32 %s990_s14, 4  ;;  %s68_s13 = int_to_ptr.vmem [resolvable:$true] %s67_s13  ;;  %s29_s15 = int_to_ptr.vmem [resolvable:$true] %s28_s15 }
  0x17   :  { %s844_s19 = scalar_lea.hbm %s1214_s6, 1024 }
  0x18   :  { %p845_p8 = scmp.ne.s32.totalorder %s1214_s6, %s844_s19  ;;  %p848_p9 = scmp.lt.u32.totalorder %s844_s19, %s1214_s6 }
  0x1a   :  { %p850_p10 = pnand %p848_p9, %p845_p8 }
  0x1c   :  { %853 = shalt.err (!%p850_p10)
}
  0x1d   :  { %s854_s1 = scalar_lea.vmem %s68_s13, 1024  ;;  %p859_p12 = scmp.lt.s32.totalorder %s68_s13, %s68_s13 }
  0x1e   :  { %p855_p11 = scmp.ne.s32.totalorder %s68_s13, %s854_s1  ;;  %p860_p13 = scmp.lt.s32.totalorder %s854_s1, %s854_s1 }
  0x20   :  { %p861_p0 = por %p860_p13, %p859_p12 }
  0x22   :  { %p862_p1 = pnand %p861_p0, %p855_p11 }
  0x24   :  { %865 = shalt.err (!%p862_p1)
}
  0x25   :  { %73 = dma.hbm_to_vmem [thread:$0]  %s1214_s6, 1024, %s68_s13, [#allocation9], %s987_s27, %s987_s27, %s988_s28  }
  0x26   :  { %s866_s29 = scalar_lea.hbm %s1208_s0, 64 }
  0x27   :  { %p867_p2 = scmp.ne.s32.totalorder %s1208_s0, %s866_s29  ;;  %p870_p3 = scmp.lt.u32.totalorder %s866_s29, %s1208_s0 }
  0x29   :  { %p872_p4 = pnand %p870_p3, %p867_p2 }
  0x2b   :  { %875 = shalt.err (!%p872_p4)
}
  0x2c   :  { %s876_s17 = scalar_lea.vmem %s29_s15, 64  ;;  %p881_p6 = scmp.lt.s32.totalorder %s29_s15, %s29_s15 }
  0x2d   :  { %p877_p5 = scmp.ne.s32.totalorder %s29_s15, %s876_s17  ;;  %p882_p7 = scmp.lt.s32.totalorder %s876_s17, %s876_s17 }
  0x2f   :  { %p883_p8 = por %p882_p7, %p881_p6 }
  0x31   :  { %p884_p9 = pnand %p883_p8, %p877_p5 }
  0x33   :  { %887 = shalt.err (!%p884_p9)
}
  0x34   :  { %31 = dma.hbm_to_vmem [thread:$0]  %s1208_s0, 64, %s29_s15, [#allocation3]  }
  0x35   :  { %s991_s19 = smov [#allocation7]   ;;  %s992_s21 = smov [#allocation10]  }
  0x36   :  { %s53_s20 = sshll.u32 %s991_s19, 4  ;;  %s81_s22 = sshll.u32 %s992_s21, 4  ;;  %s54_s20 = int_to_ptr.vmem [resolvable:$true] %s53_s20  ;;  %s82_s22 = int_to_ptr.vmem [resolvable:$true] %s81_s22 }
  0x37   :  { %s888_s18 = scalar_lea.hbm %s1212_s4, 1024 }
  0x38   :  { %p889_p10 = scmp.ne.s32.totalorder %s1212_s4, %s888_s18  ;;  %p892_p11 = scmp.lt.u32.totalorder %s888_s18, %s1212_s4 }
  0x3a   :  { %p894_p12 = pnand %p892_p11, %p889_p10 }
  0x3c   :  { %897 = shalt.err (!%p894_p12)
}
  0x3d   :  { %s898_s0 = scalar_lea.vmem %s54_s20, 1024  ;;  %p903_p0 = scmp.lt.s32.totalorder %s54_s20, %s54_s20 }
  0x3e   :  { %p899_p13 = scmp.ne.s32.totalorder %s54_s20, %s898_s0  ;;  %p904_p1 = scmp.lt.s32.totalorder %s898_s0, %s898_s0 }
  0x40   :  { %p905_p2 = por %p904_p1, %p903_p0 }
  0x42   :  { %p906_p3 = pnand %p905_p2, %p899_p13 }
  0x44   :  { %909 = shalt.err (!%p906_p3)
}
  0x45   :  { %59 = dma.hbm_to_vmem [thread:$0]  %s1212_s4, 1024, %s54_s20, [#allocation6], %s987_s27, %s987_s27, %s988_s28  }
  0x46   :  { %s910_s16 = scalar_lea.hbm %s1216_s8, 1024 }
  0x47   :  { %p911_p4 = scmp.ne.s32.totalorder %s1216_s8, %s910_s16  ;;  %p914_p5 = scmp.lt.u32.totalorder %s910_s16, %s1216_s8 }
  0x49   :  { %p916_p6 = pnand %p914_p5, %p911_p4 }
  0x4b   :  { %919 = shalt.err (!%p916_p6)
}
  0x4c   :  { %s920_s21 = scalar_lea.vmem %s82_s22, 1024  ;;  %p925_p8 = scmp.lt.s32.totalorder %s82_s22, %s82_s22 }
  0x4d   :  { %p921_p7 = scmp.ne.s32.totalorder %s82_s22, %s920_s21  ;;  %p926_p9 = scmp.lt.s32.totalorder %s920_s21, %s920_s21 }
  0x4f   :  { %p927_p10 = por %p926_p9, %p925_p8 }
  0x51   :  { %p928_p11 = pnand %p927_p10, %p921_p7 }
  0x53   :  { %931 = shalt.err (!%p928_p11)
}
  0x54   :  { %87 = dma.hbm_to_vmem [thread:$0]  %s1216_s8, 1024, %s82_s22, [#allocation9], %s987_s27, %s987_s27, %s988_s28  }
  0x55   :  { %976 = dma.done.wait [#allocation3], 64  }
  0x56   :  { %977 = vsyncadd [#allocation3], 4294967232 }
  0x57   :  { %978 = dma.done.wait [#allocation6], 2048  }
  0x58   :  { %979 = vsyncadd [#allocation6], 4294965248 }
  0x59   :  { %980 = dma.done.wait [#allocation9], 2048  }
  0x5a   :  { %981 = vsyncadd [#allocation9], 4294965248  ;;  %v993_v0 = vmov 0.0   ;;  %vm994_vm0 = vmmov 0   ;;  %v788_v1 = vld [vmem:[#allocation5] sm:$0xff]   ;;  %v789_v2 = vld [vmem:[#allocation5 + $0x8] sm:$0xff]   ;;  %v241_v45 = vlaneseq }
  0x5b   :  { %697 = vmatprep.subr.bf16.mxu0 %v993_v0  ;;  %713 = vmatprep.mubr.msk.bf16.mxu0 %vm994_vm0, %v993_v0  ;;  %v790_v3 = vld [vmem:[#allocation5 + $0x10] sm:$0xff]   ;;  %v791_v4 = vld [vmem:[#allocation5 + $0x18] sm:$0xff]   ;;  %v792_v5 = vld [vmem:[#allocation5 + $0x20] sm:$0xff]  }
  0x5c   :  { %717 = vmatprep.subr.bf16.mxu1 %v993_v0  ;;  %733 = vmatprep.mubr.msk.bf16.mxu1 %vm994_vm0, %v993_v0  ;;  %v793_v6 = vld [vmem:[#allocation5 + $0x28] sm:$0xff]   ;;  %v794_v7 = vld [vmem:[#allocation5 + $0x30] sm:$0xff]   ;;  %v795_v8 = vld [vmem:[#allocation5 + $0x38] sm:$0xff]   ;;  %v242_v46 = vshrl.u32 %v241_v45, 7 }
  0x5d   :  { %698 = vmatpush3.bf16.msra.mxu0 %v788_v1  ;;  %v106_v9 = vld [vmem:[#allocation2] sm:$0xf]  ;;  %v796_v10 = vld [vmem:[#allocation7] sm:$0xff]   ;;  %v797_v11 = vld [vmem:[#allocation7 + $0x8] sm:$0xff]  }
  0x5e   :  { %699 = vmatprep.subr.bf16.mxu0 %v993_v0  ;;  %718 = vmatpush3.bf16.msra.mxu1 %v796_v10  ;;  %v798_v12 = vld [vmem:[#allocation7 + $0x10] sm:$0xff]   ;;  %v799_v13 = vld [vmem:[#allocation7 + $0x18] sm:$0xff]   ;;  %v800_v14 = vld [vmem:[#allocation7 + $0x20] sm:$0xff]   ;;  %v243_v48 = vsub.s32 0, %v242_v46 }
  0x5f   :  { %719 = vmatprep.subr.bf16.mxu1 %v993_v0  ;;  %v801_v15 = vld [vmem:[#allocation7 + $0x28] sm:$0xff]   ;;  %v802_v16 = vld [vmem:[#allocation7 + $0x30] sm:$0xff]   ;;  %v803_v17 = vld [vmem:[#allocation7 + $0x38] sm:$0xff]  }
  0x60   :  { %v804_v18 = vld [vmem:[#allocation8] sm:$0xff]   ;;  %v805_v19 = vld [vmem:[#allocation8 + $0x8] sm:$0xff]   ;;  %v806_v20 = vld [vmem:[#allocation8 + $0x10] sm:$0xff]  }
  0x61   :  { %700 = vmatpush3.bf16.msra.mxu0 %v789_v2  ;;  %v807_v21 = vld [vmem:[#allocation8 + $0x18] sm:$0xff]   ;;  %v808_v22 = vld [vmem:[#allocation8 + $0x20] sm:$0xff]   ;;  %v809_v23 = vld [vmem:[#allocation8 + $0x28] sm:$0xff]  }
  0x62   :  { %701 = vmatprep.subr.bf16.mxu0 %v993_v0  ;;  %720 = vmatpush3.bf16.msra.mxu1 %v797_v11  ;;  %v233_v47 = vld [vmem:[%s1210_s2] sm:$0x1]  ;;  %v810_v60 = vld [vmem:[#allocation8 + $0x30] sm:$0xff]   ;;  %v812_v62 = vld [vmem:[#allocation10] sm:$0xff]  }
  0x63   :  { %721 = vmatprep.subr.bf16.mxu1 %v993_v0  ;;  %v237_v51 = vld [vmem:[%s1211_s3] sm:$0x1]  ;;  %v813_v63 = vld [vmem:[#allocation10 + $0x8] sm:$0xff]   ;;  %v814_v1 = vld [vmem:[#allocation10 + $0x10] sm:$0xff]  }
  0x64   :  { %v811_v61 = vld [vmem:[#allocation8 + $0x38] sm:$0xff]  }
  0x65   :  { %702 = vmatpush3.bf16.msra.mxu0 %v790_v3  ;;  %v815_v2 = vld [vmem:[#allocation10 + $0x18] sm:$0xff]   ;;  %v816_v3 = vld [vmem:[#allocation10 + $0x20] sm:$0xff]  }
  0x66   :  { %703 = vmatprep.subr.bf16.mxu0 %v993_v0  ;;  %722 = vmatpush3.bf16.msra.mxu1 %v798_v12 }
  0x67   :  { %723 = vmatprep.subr.bf16.mxu1 %v993_v0 }
  0x69   :  { %704 = vmatpush3.bf16.msra.mxu0 %v791_v4  ;;  %v817_v4 = vld [vmem:[#allocation10 + $0x28] sm:$0xff]  }
  0x6a   :  { %705 = vmatprep.subr.bf16.mxu0 %v993_v0  ;;  %724 = vmatpush3.bf16.msra.mxu1 %v799_v13  ;;  %v818_v13 = vld [vmem:[#allocation10 + $0x30] sm:$0xff]  }
  0x6b   :  { %725 = vmatprep.subr.bf16.mxu1 %v993_v0 }
  0x6d   :  { %706 = vmatpush3.bf16.msra.mxu0 %v792_v5  ;;  %v634_v5 = vld [vmem:[%s1213_s5] ss:$0 sm:$0xff]  ;;  %s995_s5 = smov [#allocation12]  }
  0x6e   :  { %707 = vmatprep.subr.bf16.mxu0 %v993_v0  ;;  %726 = vmatpush3.bf16.msra.mxu1 %v800_v14  ;;  %v819_v14 = vld [vmem:[#allocation10 + $0x38] sm:$0xff]   ;;  %s611_s18 = sshll.u32 %s995_s5, 4  ;;  %s612_s18 = int_to_ptr.vmem [resolvable:$true] %s611_s18 }
  0x6f   :  { %727 = vmatprep.subr.bf16.mxu1 %v993_v0  ;;  %s932_s24 = scalar_lea.vmem %s612_s18, 128  ;;  %p937_p13 = scmp.lt.s32.totalorder %s612_s18, %s612_s18 }
  0x70   :  { %p933_p12 = scmp.ne.s32.totalorder %s612_s18, %s932_s24  ;;  %p938_p0 = scmp.lt.s32.totalorder %s932_s24, %s932_s24 }
  0x71   :  { %708 = vmatpush3.bf16.msra.mxu0 %v793_v6 }
  0x72   :  { %709 = vmatprep.subr.bf16.mxu0 %v993_v0  ;;  %728 = vmatpush3.bf16.msra.mxu1 %v801_v15  ;;  %v643_v15 = vld [vmem:[%s1215_s7] ss:$0 sm:$0xff]  ;;  %p939_p1 = por %p938_p0, %p937_p13 }
  0x73   :  { %729 = vmatprep.subr.bf16.mxu1 %v993_v0 }
  0x74   :  { %p940_p2 = pnand %p939_p1, %p933_p12 }
  0x75   :  { %710 = vmatpush3.bf16.msra.mxu0 %v794_v7 }
  0x76   :  { %711 = vmatprep.subr.bf16.mxu0 %v993_v0  ;;  %730 = vmatpush3.bf16.msra.mxu1 %v802_v16 }
  0x77   :  { %731 = vmatprep.subr.bf16.mxu1 %v993_v0 }
  0x79   :  { %712 = vmatpush3.bf16.msra.mxu0 %v795_v8 }
  0x7a   :  { %737 = vmatprep.subr.bf16.mxu0 %v993_v0  ;;  %732 = vmatpush3.bf16.msra.mxu1 %v803_v17 }
  0x7b   :  { %757 = vmatprep.subr.bf16.mxu1 %v993_v0 }
  0x7c   :  { %714 = vmatmul.mubr.bf16.vlgmr.msra.gmra.mrb[0].mxu0 %v106_v9 }
  0x7d   :  { %753 = vmatprep.mubr.msk.bf16.mxu0 %vm994_vm0, %v993_v0  ;;  %738 = vmatpush3.bf16.msra.mxu0 %v804_v18 }
  0x7e   :  { %739 = vmatprep.subr.bf16.mxu0 %v993_v0 }
  0x81   :  { %740 = vmatpush3.bf16.msra.mxu0 %v805_v19 }
  0x82   :  { %741 = vmatprep.subr.bf16.mxu0 %v993_v0 }
  0x85   :  { %742 = vmatpush3.bf16.msra.mxu0 %v806_v20 }
  0x86   :  { %743 = vmatprep.subr.bf16.mxu0 %v993_v0 }
  0x89   :  { %744 = vmatpush3.bf16.msra.mxu0 %v807_v21 }
  0x8a   :  { %745 = vmatprep.subr.bf16.mxu0 %v993_v0 }
  0x8d   :  { %746 = vmatpush3.bf16.msra.mxu0 %v808_v22 }
  0x8e   :  { %747 = vmatprep.subr.bf16.mxu0 %v993_v0 }
  0x91   :  { %748 = vmatpush3.bf16.msra.mxu0 %v809_v23 }
  0x92   :  { %749 = vmatprep.subr.bf16.mxu0 %v993_v0 }
  0x95   :  { %750 = vmatpush3.bf16.msra.mxu0 %v810_v60 }
  0x96   :  { %751 = vmatprep.subr.bf16.mxu0 %v993_v0 }
  0x99   :  { %752 = vmatpush3.bf16.msra.mxu0 %v811_v61 }
 0x14f   :  { %v205_v24 = vpop.f32.mrb[0].mxu0 }
 0x150   :  { %v211_v25 = vrot.slane %v205_v24, 4  ;;  %v715_v26 = vpop.f32.mrb[1].mxu0 }
 0x151   :  { %v208_v27 = vpop.f32.mrb[2].mxu0 }
 0x152   :  { %v212_v28 = vadd.f32 %v211_v25, %v205_v24  ;;  %v716_v29 = vpop.f32.mrb[3].mxu0 }
 0x154   :  { %v213_v30 = vrot.slane %v212_v28, 2 }
 0x156   :  { %v214_v31 = vadd.f32 %v213_v30, %v212_v28 }
 0x158   :  { %v215_v32 = vrot.slane %v214_v31, 1 }
 0x15a   :  { %v216_v33 = vadd.f32 %v215_v32, %v214_v31 }
 0x15c   :  { %v217_v34 = vmul.f32 0.125, %v216_v33 }
 0x15e   :  { %v223_v35 = vsub.f32 %v205_v24, %v217_v34 }
 0x160   :  { %v225_v36 = vmul.f32 %v223_v35, %v223_v35 }
 0x162   :  { %v226_v37 = vrot.slane %v225_v36, 4 }
 0x164   :  { %v227_v38 = vadd.f32 %v226_v37, %v225_v36 }
 0x166   :  { %v228_v39 = vrot.slane %v227_v38, 2 }
 0x168   :  { %v229_v40 = vadd.f32 %v228_v39, %v227_v38 }
 0x16a   :  { %v230_v41 = vrot.slane %v229_v40, 1 }
 0x16c   :  { %v231_v42 = vadd.f32 %v230_v41, %v229_v40 }
 0x16e   :  { %v232_v43 = vmul.f32 0.125, %v231_v42 }
 0x170   :  { %v234_v44 = vadd.f32 1e-05, %v232_v43 }
 0x172   :  { %820 = vrsqrt.f32 %v234_v44 }
 0x17c   :  { %v821_v49 = vpop.eup %820 }
 0x17d   :  { %v236_v50 = vmul.f32 %v821_v49, %v233_v47 }
 0x17f   :  { %v238_v52 = vmul.f32 %v236_v50, %v217_v34  ;;  %v244_v53 = vrot.slane %v236_v50, %v243_v48 }
 0x181   :  { %v239_v54 = vsub.f32 %v237_v51, %v238_v52  ;;  %v246_v55 = vmul.f32 %v244_v53, %v205_v24 }
 0x183   :  { %v251_v56 = vrot.slane %v239_v54, %v243_v48 }
 0x185   :  { %v253_v57 = vadd.f32 %v251_v56, %v246_v55 }
 0x187   :  { %v254_v58 = vmax.f32 %v253_v57, 0.0 }
 0x189   :  { %v256_v59 = vpack.c.bf16 %v254_v58, %v254_v58  ;;  %255 = vst [vmem:[#allocation12] sm:$0xff] %v254_v58 }
 0x18b   :  { %734 = vmatmul.mubr.bf16.vlgmr.msra.gmra.mrb[0].mxu1 %v256_v59 }
 0x18c   :  { %773 = vmatprep.mubr.msk.bf16.mxu1 %vm994_vm0, %v993_v0  ;;  %758 = vmatpush3.bf16.msra.mxu1 %v812_v62 }
 0x18d   :  { %759 = vmatprep.subr.bf16.mxu1 %v993_v0 }
 0x190   :  { %760 = vmatpush3.bf16.msra.mxu1 %v813_v63 }
 0x191   :  { %761 = vmatprep.subr.bf16.mxu1 %v993_v0 }
 0x194   :  { %762 = vmatpush3.bf16.msra.mxu1 %v814_v1 }
 0x195   :  { %763 = vmatprep.subr.bf16.mxu1 %v993_v0 }
 0x198   :  { %764 = vmatpush3.bf16.msra.mxu1 %v815_v2 }
 0x199   :  { %765 = vmatprep.subr.bf16.mxu1 %v993_v0 }
 0x19c   :  { %766 = vmatpush3.bf16.msra.mxu1 %v816_v3 }
 0x19d   :  { %767 = vmatprep.subr.bf16.mxu1 %v993_v0 }
 0x1a0   :  { %768 = vmatpush3.bf16.msra.mxu1 %v817_v4 }
 0x1a1   :  { %769 = vmatprep.subr.bf16.mxu1 %v993_v0 }
 0x1a4   :  { %770 = vmatpush3.bf16.msra.mxu1 %v818_v13 }
 0x1a5   :  { %771 = vmatprep.subr.bf16.mxu1 %v993_v0 }
 0x1a8   :  { %772 = vmatpush3.bf16.msra.mxu1 %v819_v14 }
 0x25e   :  { %v362_v6 = vpop.f32.mrb[0].mxu1 }
 0x25f   :  { %v363_v7 = vadd.f32 %v634_v5, %v362_v6  ;;  %v735_v8 = vpop.f32.mrb[1].mxu1 }
 0x260   :  { %v365_v9 = vpop.f32.mrb[2].mxu1 }
 0x261   :  { %v368_v10 = vmax.f32 %v363_v7, 0.0  ;;  %v736_v11 = vpop.f32.mrb[3].mxu1 }
 0x263   :  { %v369_v12 = vpack.c.bf16 %v368_v10, %v368_v10 }
 0x265   :  { %754 = vmatmul.mubr.bf16.vlgmr.msra.gmra.mrb[4].mxu0 %v369_v12 }
 0x338   :  { %v475_v16 = vpop.f32.mrb[4].mxu0 }
 0x339   :  { %v476_v17 = vadd.f32 %v643_v15, %v475_v16  ;;  %v755_v18 = vpop.f32.mrb[5].mxu0 }
 0x33a   :  { %v478_v19 = vpop.f32.mrb[6].mxu0 }
 0x33b   :  { %v481_v20 = vmax.f32 %v476_v17, 0.0  ;;  %v756_v21 = vpop.f32.mrb[7].mxu0 }
 0x33d   :  { %v482_v22 = vpack.c.bf16 %v481_v20, %v481_v20 }
 0x33f   :  { %774 = vmatmul.mubr.bf16.vlgmr.msra.gmra.mrb[4].mxu1 %v482_v22 }
 0x340   :  { %943 = shalt.err (!%p940_p2)
}
 0x341   :  { %s944_s26 = scalar_lea.hbm %s1219_s11, 128 }
 0x342   :  { %p945_p3 = scmp.ne.s32.totalorder %s1219_s11, %s944_s26  ;;  %p948_p4 = scmp.lt.u32.totalorder %s944_s26, %s1219_s11 }
 0x344   :  { %p950_p5 = pnand %p948_p4, %p945_p3 }
 0x346   :  { %953 = shalt.err (!%p950_p5)
}
 0x347   :  { %614 = dma.vmem_to_hbm [thread:$0]  %s612_s18, 128, %s1219_s11, [#allocation13]   ;;  %v652_v0 = vld [vmem:[%s1217_s9] ss:$0 sm:$0xff] }
 0x348   :  { %s996_s6 = smov [#allocation11]  }
 0x349   :  { %s601_s13 = sshll.u32 %s996_s6, 4  ;;  %s602_s13 = int_to_ptr.vmem [resolvable:$true] %s601_s13 }
 0x34a   :  { %s954_s19 = scalar_lea.vmem %s602_s13, 128  ;;  %p959_p7 = scmp.lt.s32.totalorder %s602_s13, %s602_s13 }
 0x34b   :  { %p955_p6 = scmp.ne.s32.totalorder %s602_s13, %s954_s19  ;;  %p960_p8 = scmp.lt.s32.totalorder %s954_s19, %s954_s19 }
 0x34d   :  { %p961_p9 = por %p960_p8, %p959_p7 }
 0x34f   :  { %p962_p10 = pnand %p961_p9, %p955_p6 }
 0x412   :  { %v588_v23 = vpop.f32.mrb[4].mxu1 }
 0x413   :  { %v589_v24 = vadd.f32 %v652_v0, %v588_v23  ;;  %v775_v25 = vpop.f32.mrb[5].mxu1 }
 0x414   :  { %v591_v26 = vpop.f32.mrb[6].mxu1 }
 0x415   :  { %594 = vst [vmem:[#allocation11] sm:$0xff] %v589_v24  ;;  %v776_v27 = vpop.f32.mrb[7].mxu1 }
 0x416   :  { %965 = shalt.err (!%p962_p10)
}
 0x417   :  { %s966_s9 = scalar_lea.hbm %s1218_s10, 128 }
 0x418   :  { %p967_p11 = scmp.ne.s32.totalorder %s1218_s10, %s966_s9  ;;  %p970_p12 = scmp.lt.u32.totalorder %s966_s9, %s1218_s10 }
 0x41a   :  { %p972_p13 = pnand %p970_p12, %p967_p11 }
 0x41c   :  { %975 = shalt.err (!%p972_p13)
}
 0x41d   :  { %604 = dma.vmem_to_hbm [thread:$0]  %s602_s13, 128, %s1218_s10, [#allocation4]  }
 0x41e   :  { %982 = dma.done.wait [#allocation4], 128  }
 0x41f   :  { %983 = vsyncadd [#allocation4], 4294967168 }
 0x420   :  { %984 = dma.done.wait [#allocation13], 128  }
 0x421   :  { %985 = vsyncadd [#allocation13], 4294967168 }
 0x422   :  { %621 = vsyncpa [#allocation3], 1 }
 0x423   :  { %622 = vsyncpa [#allocation6], 1 }
 0x424   :  { %623 = vsyncpa [#allocation9], 1 }
 0x425   :  { %624 = vsyncpa [#allocation4], 1 }
 0x426   :  { %625 = vsyncpa [#allocation13], 1 }

</bundles_post_ra>
